<compile_context>
chip_gen: v5e
topology: v5e:2x2
jax: 0.10.0
libtpu: 0.0.40
codegen_flags: <defaults>
</compile_context>

<pallas_src>
import jax
import jax.numpy as jnp
from jax.experimental import pallas as pl
from jax.experimental.pallas import tpu as pltpu


def _round_up(x, m):
    return (x + m - 1) // m * m


# ----------------------------------------------------------------- kernels --
def _ff_kernel_fused(x_ref, w1_ref, b1_ref, w2_ref, b2_ref, o_ref):
    """Resident-weights path (single hidden tile): out = relu(x@W1+b1)@W2+b2."""
    x = x_ref[...].astype(w1_ref.dtype)          # cast tile in-kernel, no HBM pre-pass
    h = jnp.dot(x, w1_ref[...], preferred_element_type=jnp.float32) + b1_ref[...]
    h = jnp.maximum(h, 0.0)
    y = jnp.dot(h.astype(w2_ref.dtype), w2_ref[...],
                preferred_element_type=jnp.float32) + b2_ref[...]
    # Dropout is the identity in eval mode.
    o_ref[...] = y.astype(o_ref.dtype)


def _ff_kernel_streamed(x_ref, w1_ref, b1_ref, w2_ref, b2_ref, o_ref, acc_ref):
    """Hidden dim streamed in th-wide panels; f32 accumulator along grid axis 1."""
    k = pl.program_id(1)

    @pl.when(k == 0)
    def _init():
        acc_ref[...] = jnp.zeros_like(acc_ref)

    x = x_ref[...].astype(w1_ref.dtype)
    h = jnp.dot(x, w1_ref[...], preferred_element_type=jnp.float32) + b1_ref[...]
    h = jnp.maximum(h, 0.0)
    acc_ref[...] += jnp.dot(h.astype(w2_ref.dtype), w2_ref[...],
                            preferred_element_type=jnp.float32)

    @pl.when(k == pl.num_programs(1) - 1)
    def _finalize():
        # Second bias added exactly once; Dropout (eval mode) is the identity.
        o_ref[...] = (acc_ref[...] + b2_ref[...]).astype(o_ref.dtype)


# ----------------------------------------------------------------- wrapper --
def feed_forward(x, w1, b1, w2, b2, *, tm=512, th=512,
                 compute_dtype=jnp.bfloat16, force_th=None):
    """y = relu(x @ w1 + b1) @ w2 + b2.   x: (B, T, C) -> (B, T, C) in x.dtype.

    w1: (C, 4C), w2: (4C, C)  (PyTorch weights transposed).  For best perf,
    pre-convert the weights to `compute_dtype` once outside the hot path.
    """
    B, T, C = x.shape
    H = w1.shape[1]
    M = B * T

    xbytes = jnp.dtype(x.dtype).itemsize
    obytes = xbytes
    cbytes = jnp.dtype(compute_dtype).itemsize

    # ---- generation-aware VMEM budget (v5e/v6e: 128 MiB; v7x: 64 MiB / TC) --
    try:
        vmem_cap = int(pltpu.get_tpu_info().vmem_capacity_bytes)
    except Exception:
        vmem_cap = 64 << 20                        # safe on every generation
    vmem_budget = int(0.85 * vmem_cap)             # headroom for Mosaic scratch

    # ---- tile selection ------------------------------------------------------
    # Arithmetic intensity w.r.t. streamed weights ~ tm FLOPs/byte; tm=512
    # clears the v6e (~655 F/B) and v7x (~311 F/B) roofline knees.
    tm_eff = min(tm, _round_up(M, 8))

    def footprint(tm_, th_, n_k):
        # Conservative: assume every input is double-buffered by the pipeliner.
        return (2 * tm_ * C * xbytes               # x row tile
                + 2 * C * th_ * cbytes             # W1 panel
                + 2 * th_ * 4                      # b1 panel
                + 2 * th_ * C * cbytes             # W2 panel
                + 2 * C * 4                        # b2
                + 2 * tm_ * C * obytes             # out tile
                + tm_ * th_ * (4 + cbytes)         # hidden intermediate (f32 + cast)
                + (0 if n_k == 1 else tm_ * C * 4))   # f32 accumulator scratch

    if force_th is not None:                       # test hook: force streaming
        th_eff = min(_round_up(force_th, 128), _round_up(H, 128))
    elif footprint(tm_eff, H, 1) <= vmem_budget:
        # Resident-weights fast path: W1/W2 stay in VMEM for the whole call and
        # are fetched from HBM exactly once instead of once per row tile.
        th_eff = H
    else:
        # Stream the hidden dim.  Shrink th before tm (keeps MXU-friendly rows
        # while respecting v7x's 64 MiB VMEM).
        th_eff = min(_round_up(min(th, H), 128), _round_up(H, 128))
        while th_eff > 128 and H % th_eff != 0:    # prefer a divisor of H: no weight pad
            th_eff -= 128
        while th_eff > 128 and footprint(tm_eff, th_eff, 2) > vmem_budget:
            th_eff -= 128
        while tm_eff > 64 and footprint(tm_eff, th_eff, 2) > vmem_budget:
            tm_eff = max(8, _round_up(tm_eff // 2, 8))

    Hp = _round_up(H, th_eff)
    n_rows = (M + tm_eff - 1) // tm_eff            # ragged tail: Pallas partial-block masking
    n_k = Hp // th_eff

    # ---- weight prep (no per-call HBM pass when dtypes already match) -------
    if Hp != H:
        w1 = jnp.pad(w1, ((0, 0), (0, Hp - H)))
        b1 = jnp.pad(b1, (0, Hp - H))
        w2 = jnp.pad(w2, ((0, Hp - H), (0, 0)))
    w1c = w1 if w1.dtype == compute_dtype else w1.astype(compute_dtype)
    w2c = w2 if w2.dtype == compute_dtype else w2.astype(compute_dtype)
    b1f = b1.reshape(1, Hp).astype(jnp.float32)
    b2f = b2.reshape(1, C).astype(jnp.float32)
    x2 = x.reshape(M, C)                           # free view; no pad, no cast

    # ---- VMEM limit & cost hint ---------------------------------------------
    fp = footprint(tm_eff, th_eff, n_k)
    vmem_limit = min(max(int(fp * 1.25) + (2 << 20), 16 << 20), vmem_budget)

    weight_reads = 1 if n_k == 1 else n_rows       # streamed weights re-read per row tile
    cost = pl.CostEstimate(
        flops=4 * M * C * H,                       # two matmuls, 2 flops / MAC
        transcendentals=0,
        bytes_accessed=(M * C * xbytes
                        + weight_reads * 2 * C * Hp * cbytes
                        + Hp * 4 + C * 4
                        + M * C * obytes))

    if n_k == 1:
        kernel, scratch = _ff_kernel_fused, ()
    else:
        kernel, scratch = _ff_kernel_streamed, (pltpu.VMEM((tm_eff, C), jnp.float32),)

    resident = (n_k == 1)

    def run(single_buffer):
        def spec(shape, imap, invariant):
            # Grid-invariant operands need no double-buffering -> halve their VMEM.
            if single_buffer and invariant:
                return pl.BlockSpec(shape, imap, pipeline_mode=pl.Buffered(1))
            return pl.BlockSpec(shape, imap)

        grid_spec = pltpu.PrefetchScalarGridSpec(
            num_scalar_prefetch=0,
            grid=(n_rows, n_k),
            in_specs=[
                spec((tm_eff, C), lambda i, k: (i, 0), False),       # x rows
                spec((C, th_eff), lambda i, k: (0, k), resident),    # W1 panel
                spec((1, th_eff), lambda i, k: (0, k), resident),    # b1 panel
                spec((th_eff, C), lambda i, k: (k, 0), resident),    # W2 panel
                spec((1, C), lambda i, k: (0, 0), True),             # b2
            ],
            out_specs=pl.BlockSpec((tm_eff, C), lambda i, k: (i, 0)),
            scratch_shapes=scratch,
        )
        return pl.pallas_call(
            kernel,
            out_shape=jax.ShapeDtypeStruct((M, C), x.dtype),
            grid_spec=grid_spec,
            compiler_params=pltpu.CompilerParams(
                dimension_semantics=("parallel", "arbitrary"),
                vmem_limit_bytes=vmem_limit),
            cost_estimate=cost,
        )(x2, w1c, b1f, w2c, b2f)

    try:
        out2 = run(True)
    except Exception:
        # pipeline_mode=pl.Buffered unavailable/rejected in this JAX version:
        # fall back to plain double-buffered specs.
        out2 = run(False)

    return out2.reshape(B, T, C)


def _reference(x, w1, b1, w2, b2):
    h = jnp.maximum(jnp.einsum("btc,ch->bth", x, w1) + b1, 0.0)
    return jnp.einsum("bth,hc->btc", h, w2) + b2


if __name__ == "__main__":
    key = jax.random.PRNGKey(0)

    # ---- case 1: module-sized toy (n_embd=32 -> hidden=128): resident path --
    B, T, C = 2, 8, 32
    H = 4 * C
    kx, kw1, kb1, kw2, kb2, k2 = jax.random.split(key, 6)
    x = jax.random.normal(kx, (B, T, C), dtype=jnp.float32)
    w1 = jax.random.normal(kw1, (C, H), dtype=jnp.float32) * 0.05
    b1 = jax.random.normal(kb1, (H,), dtype=jnp.float32) * 0.05
    w2 = jax.random.normal(kw2, (H, C), dtype=jnp.float32) * 0.05
    b2 = jax.random.normal(kb2, (C,), dtype=jnp.float32) * 0.05
    ref = _reference(x, w1, b1, w2, b2)

    out_f32 = jax.block_until_ready(
        feed_forward(x, w1, b1, w2, b2, compute_dtype=jnp.float32))
    assert out_f32.shape == (B, T, C)
    assert jnp.allclose(out_f32, ref, atol=1e-4, rtol=1e-4), "f32 mismatch"

    out_bf16 = jax.block_until_ready(feed_forward(x, w1, b1, w2, b2))
    assert out_bf16.shape == (B, T, C)
    assert jnp.allclose(out_bf16, ref, atol=3e-2, rtol=3e-2), "bf16 mismatch"

    # ---- case 2: ragged M (partial row tile) + forced hidden streaming ------
    B2, T2, C2 = 2, 5, 64
    H2 = 4 * C2
    kx2, kw12, kb12, kw22, kb22 = jax.random.split(k2, 5)
    xb = jax.random.normal(kx2, (B2, T2, C2), dtype=jnp.float32)
    w1b = jax.random.normal(kw12, (C2, H2), dtype=jnp.float32) * 0.05
    b1b = jax.random.normal(kb12, (H2,), dtype=jnp.float32) * 0.05
    w2b = jax.random.normal(kw22, (H2, C2), dtype=jnp.float32) * 0.05
    b2b = jax.random.normal(kb22, (C2,), dtype=jnp.float32) * 0.05
    ref2 = _reference(xb, w1b, b1b, w2b, b2b)

    out2 = jax.block_until_ready(
        feed_forward(xb, w1b, b1b, w2b, b2b, compute_dtype=jnp.float32,
                     force_th=128))
    assert out2.shape == (B2, T2, C2)
    assert jnp.allclose(out2, ref2, atol=1e-3, rtol=1e-3), "streamed-H mismatch"

    print("KERNEL_OK")
</pallas_src>

<mosaic_0001>
module attributes {stable_mosaic.version = 11 : i64} {
  func.func @_ff_kernel_fused(%arg0: i32, %arg1: i32, %arg2: memref<16x32xf32, #tpu.memory_space<vmem>>, %arg3: memref<32x128xf32, #tpu.memory_space<vmem>>, %arg4: memref<1x128xf32, #tpu.memory_space<vmem>>, %arg5: memref<128x32xf32, #tpu.memory_space<vmem>>, %arg6: memref<1x32xf32, #tpu.memory_space<vmem>>, %arg7: memref<16x32xf32, #tpu.memory_space<vmem>>) attributes {dimension_semantics = [#tpu.dimension_semantics<parallel>, #tpu.dimension_semantics<arbitrary>], iteration_bounds = array<i64: 1, 1>, scalar_prefetch = 0 : i64, scratch_operands = 0 : i64, tpu.core_type = #tpu.core_type<tc>, window_params = [{transform_indices = @transform_0, window_bounds = array<i64: 16, 32>}, {pipeline_mode = #tpu.pipeline_mode<synchronous>, transform_indices = @transform_1, window_bounds = array<i64: 32, 128>}, {pipeline_mode = #tpu.pipeline_mode<synchronous>, transform_indices = @transform_2, window_bounds = array<i64: 1, 128>}, {pipeline_mode = #tpu.pipeline_mode<synchronous>, transform_indices = @transform_3, window_bounds = array<i64: 128, 32>}, {pipeline_mode = #tpu.pipeline_mode<synchronous>, transform_indices = @transform_4, window_bounds = array<i64: 1, 32>}, {transform_indices = @transform_5, window_bounds = array<i64: 16, 32>}]} {
    %c0 = arith.constant 0 : index
    %c0_0 = arith.constant 0 : index
    %0 = vector.load %arg2[%c0, %c0_0] : memref<16x32xf32, #tpu.memory_space<vmem>>, vector<16x32xf32>
    %c0_1 = arith.constant 0 : index
    %c0_2 = arith.constant 0 : index
    %1 = vector.load %arg3[%c0_1, %c0_2] : memref<32x128xf32, #tpu.memory_space<vmem>>, vector<32x128xf32>
    %cst = arith.constant dense<0.000000e+00> : vector<16x128xf32>
    %2 = tpu.matmul %0, %1, %cst {dimension_numbers = #tpu.dot_dimension_numbers<[1], [0], [0], [1], [0, 0, 1, 1], [], []>} : vector<16x32xf32>, vector<32x128xf32>, vector<16x128xf32> -> vector<16x128xf32>
    %c0_3 = arith.constant 0 : index
    %c0_4 = arith.constant 0 : index
    %3 = vector.load %arg4[%c0_3, %c0_4] : memref<1x128xf32, #tpu.memory_space<vmem>>, vector<1x128xf32>
    %4 = vector.broadcast %3 : vector<1x128xf32> to vector<16x128xf32>
    %5 = arith.addf %2, %4 : vector<16x128xf32>
    %cst_5 = arith.constant 0.000000e+00 : f32
    %6 = vector.broadcast %cst_5 : f32 to vector<16x128xf32>
    %7 = arith.maximumf %5, %6 : vector<16x128xf32>
    %c0_6 = arith.constant 0 : index
    %c0_7 = arith.constant 0 : index
    %8 = vector.load %arg5[%c0_6, %c0_7] : memref<128x32xf32, #tpu.memory_space<vmem>>, vector<128x32xf32>
    %cst_8 = arith.constant dense<0.000000e+00> : vector<16x32xf32>
    %9 = tpu.matmul %7, %8, %cst_8 {dimension_numbers = #tpu.dot_dimension_numbers<[1], [0], [0], [1], [0, 0, 1, 1], [], []>} : vector<16x128xf32>, vector<128x32xf32>, vector<16x32xf32> -> vector<16x32xf32>
    %c0_9 = arith.constant 0 : index
    %c0_10 = arith.constant 0 : index
    %10 = vector.load %arg6[%c0_9, %c0_10] : memref<1x32xf32, #tpu.memory_space<vmem>>, vector<1x32xf32>
    %11 = vector.broadcast %10 : vector<1x32xf32> to vector<16x32xf32>
    %12 = arith.addf %9, %11 : vector<16x32xf32>
    %c0_11 = arith.constant 0 : index
    %c0_12 = arith.constant 0 : index
    %13 = vector.load %arg7[%c0_11, %c0_12] : memref<16x32xf32, #tpu.memory_space<vmem>>, vector<16x32xf32>
    tpu.vector_store %arg7[%c0_11, %c0_12], %12 {strides = array<i32>} : memref<16x32xf32, #tpu.memory_space<vmem>>, vector<16x32xf32>,
    return
  }
  func.func @transform_0(%arg0: i32, %arg1: i32) -> (i32, i32) {
    %c0_i32 = arith.constant 0 : i32
    %c0_i32_0 = arith.constant 0 : i32
    return %arg0, %c0_i32 : i32, i32
  }
  func.func @transform_1(%arg0: i32, %arg1: i32) -> (i32, i32) {
    %c0_i32 = arith.constant 0 : i32
    %c0_i32_0 = arith.constant 0 : i32
    return %c0_i32, %arg1 : i32, i32
  }
  func.func @transform_2(%arg0: i32, %arg1: i32) -> (i32, i32) {
    %c0_i32 = arith.constant 0 : i32
    %c0_i32_0 = arith.constant 0 : i32
    return %c0_i32, %arg1 : i32, i32
  }
  func.func @transform_3(%arg0: i32, %arg1: i32) -> (i32, i32) {
    %c0_i32 = arith.constant 0 : i32
    %c0_i32_0 = arith.constant 0 : i32
    return %arg1, %c0_i32 : i32, i32
  }
  func.func @transform_4(%arg0: i32, %arg1: i32) -> (i32, i32) {
    %c0_i32 = arith.constant 0 : i32
    %c0_i32_0 = arith.constant 0 : i32
    %c0_i32_1 = arith.constant 0 : i32
    return %c0_i32, %c0_i32_0 : i32, i32
  }
  func.func @transform_5(%arg0: i32, %arg1: i32) -> (i32, i32) {
    %c0_i32 = arith.constant 0 : i32
    %c0_i32_0 = arith.constant 0 : i32
    return %arg0, %c0_i32 : i32, i32
  }
}

module attributes {stable_mosaic.version = 11 : i64} {
  func.func @_ff_kernel_fused(%arg0: i32, %arg1: i32, %arg2: memref<16x32xf32, #tpu.memory_space<vmem>>, %arg3: memref<32x128xf32, #tpu.memory_space<vmem>>, %arg4: memref<1x128xf32, #tpu.memory_space<vmem>>, %arg5: memref<128x32xf32, #tpu.memory_space<vmem>>, %arg6: memref<1x32xf32, #tpu.memory_space<vmem>>, %arg7: memref<16x32xf32, #tpu.memory_space<vmem>>) attributes {dimension_semantics = [#tpu.dimension_semantics<parallel>, #tpu.dimension_semantics<arbitrary>], iteration_bounds = array<i64: 1, 1>, scalar_prefetch = 0 : i64, scratch_operands = 0 : i64, tpu.core_type = #tpu.core_type<tc>, window_params = [{transform_indices = @transform_0, window_bounds = array<i64: 16, 32>}, {transform_indices = @transform_1, window_bounds = array<i64: 32, 128>}, {transform_indices = @transform_2, window_bounds = array<i64: 1, 128>}, {transform_indices = @transform_3, window_bounds = array<i64: 128, 32>}, {pipeline_mode = #tpu.pipeline_mode<synchronous>, transform_indices = @transform_4, window_bounds = array<i64: 1, 32>}, {transform_indices = @transform_5, window_bounds = array<i64: 16, 32>}]} {
    %c0 = arith.constant 0 : index
    %c0_0 = arith.constant 0 : index
    %0 = vector.load %arg2[%c0, %c0_0] : memref<16x32xf32, #tpu.memory_space<vmem>>, vector<16x32xf32>
    %c0_1 = arith.constant 0 : index
    %c0_2 = arith.constant 0 : index
    %1 = vector.load %arg3[%c0_1, %c0_2] : memref<32x128xf32, #tpu.memory_space<vmem>>, vector<32x128xf32>
    %cst = arith.constant dense<0.000000e+00> : vector<16x128xf32>
    %2 = tpu.matmul %0, %1, %cst {dimension_numbers = #tpu.dot_dimension_numbers<[1], [0], [0], [1], [0, 0, 1, 1], [], []>} : vector<16x32xf32>, vector<32x128xf32>, vector<16x128xf32> -> vector<16x128xf32>
    %c0_3 = arith.constant 0 : index
    %c0_4 = arith.constant 0 : index
    %3 = vector.load %arg4[%c0_3, %c0_4] : memref<1x128xf32, #tpu.memory_space<vmem>>, vector<1x128xf32>
    %4 = vector.broadcast %3 : vector<1x128xf32> to vector<16x128xf32>
    %5 = arith.addf %2, %4 : vector<16x128xf32>
    %cst_5 = arith.constant 0.000000e+00 : f32
    %6 = vector.broadcast %cst_5 : f32 to vector<16x128xf32>
    %7 = arith.maximumf %5, %6 : vector<16x128xf32>
    %c0_6 = arith.constant 0 : index
    %c0_7 = arith.constant 0 : index
    %8 = vector.load %arg5[%c0_6, %c0_7] : memref<128x32xf32, #tpu.memory_space<vmem>>, vector<128x32xf32>
    %cst_8 = arith.constant dense<0.000000e+00> : vector<16x32xf32>
    %9 = tpu.matmul %7, %8, %cst_8 {dimension_numbers = #tpu.dot_dimension_numbers<[1], [0], [0], [1], [0, 0, 1, 1], [], []>} : vector<16x128xf32>, vector<128x32xf32>, vector<16x32xf32> -> vector<16x32xf32>
    %c0_9 = arith.constant 0 : index
    %c0_10 = arith.constant 0 : index
    %10 = vector.load %arg6[%c0_9, %c0_10] : memref<1x32xf32, #tpu.memory_space<vmem>>, vector<1x32xf32>
    %11 = vector.broadcast %10 : vector<1x32xf32> to vector<16x32xf32>
    %12 = arith.addf %9, %11 : vector<16x32xf32>
    %c0_11 = arith.constant 0 : index
    %c0_12 = arith.constant 0 : index
    %13 = vector.load %arg7[%c0_11, %c0_12] : memref<16x32xf32, #tpu.memory_space<vmem>>, vector<16x32xf32>
    tpu.vector_store %arg7[%c0_11, %c0_12], %12 {strides = array<i32>} : memref<16x32xf32, #tpu.memory_space<vmem>>, vector<16x32xf32>,
    return
  }
  func.func @transform_0(%arg0: i32, %arg1: i32) -> (i32, i32) {
    %c0_i32 = arith.constant 0 : i32
    %c0_i32_0 = arith.constant 0 : i32
    return %arg0, %c0_i32 : i32, i32
  }
  func.func @transform_1(%arg0: i32, %arg1: i32) -> (i32, i32) {
    %c0_i32 = arith.constant 0 : i32
    %c0_i32_0 = arith.constant 0 : i32
    return %c0_i32, %arg1 : i32, i32
  }
  func.func @transform_2(%arg0: i32, %arg1: i32) -> (i32, i32) {
    %c0_i32 = arith.constant 0 : i32
    %c0_i32_0 = arith.constant 0 : i32
    return %c0_i32, %arg1 : i32, i32
  }
  func.func @transform_3(%arg0: i32, %arg1: i32) -> (i32, i32) {
    %c0_i32 = arith.constant 0 : i32
    %c0_i32_0 = arith.constant 0 : i32
    return %arg1, %c0_i32 : i32, i32
  }
  func.func @transform_4(%arg0: i32, %arg1: i32) -> (i32, i32) {
    %c0_i32 = arith.constant 0 : i32
    %c0_i32_0 = arith.constant 0 : i32
    %c0_i32_1 = arith.constant 0 : i32
    return %c0_i32, %c0_i32_0 : i32, i32
  }
  func.func @transform_5(%arg0: i32, %arg1: i32) -> (i32, i32) {
    %c0_i32 = arith.constant 0 : i32
    %c0_i32_0 = arith.constant 0 : i32
    return %arg0, %c0_i32 : i32, i32
  }
}

</mosaic_0001>

<bundles_post_ra>
// kernel: tpu_custom_call.1
= control target key start
LH: loop header
LB: loop body
LE: loop exit
PB: predicated region body
PF: predicated region fallthrough
CT: control target
= control target key end

     0   :  { %vm31_vm0 = vcmask 261120   ;;  %s287_s0 = inlined_call_operand.vmem [shape: f32[16,32], index: 0, kind: input, shape index: {}]   ;;  %s288_s1 = inlined_call_operand.vmem [shape: f32[32,128], index: 1, kind: input, shape index: {}]   ;;  %s289_s2 = inlined_call_operand.vmem [shape: f32[1,128], index: 2, kind: input, shape index: {}]   ;;  %s290_s3 = inlined_call_operand.vmem [shape: f32[128,32], index: 3, kind: input, shape index: {}]   ;;  %s291_s4 = inlined_call_operand.vmem [shape: f32[1,32], index: 4, kind: input, shape index: {}]   ;;  %s292_s5 = inlined_call_operand.hbm [shape: f32[16,32], index: 5, kind: output, shape index: {}]  }
   0x1   :  { %v26_v0 = vld [vmem:[%s288_s1 + $0x18] sm:$0xff]  ;;  %v25_v1 = vld [vmem:[%s288_s1 + $0x10] sm:$0xff]  ;;  %v24_v2 = vld [vmem:[%s288_s1 + $0x8] sm:$0xff] }
   0x2   :  { %50 = vmatpush.msra.mxu0 %v26_v0  ;;  %v78_v3 = vld [vmem:[%s290_s3 + $0x78] sm:$0xff]  ;;  %v77_v4 = vld [vmem:[%s290_s3 + $0x70] sm:$0xff]  ;;  %v23_v5 = vld [vmem:[%s288_s1] sm:$0xff] }
   0x3   :  { %83 = vmatpush.msra.mxu1 %v78_v3  ;;  %v76_v6 = vld [vmem:[%s290_s3 + $0x68] sm:$0xff]  ;;  %128 = vmatpush.msra.mxu2 %v78_v3  ;;  %v21_v7 = vld [vmem:[%s287_s0] sm:$0xff] }
   0x4   :  { %51 = vmatpush.msra.mxu0 %v25_v1  ;;  %v75_v8 = vld [vmem:[%s290_s3 + $0x60] sm:$0xff] }
   0x5   :  { %84 = vmatpush.msra.mxu1 %v77_v4  ;;  %129 = vmatpush.msra.mxu2 %v77_v4 }
   0x6   :  { %52 = vmatpush.msra.mxu0 %v24_v2 }
   0x7   :  { %85 = vmatpush.msra.mxu1 %v76_v6 }
   0x8   :  { %53 = vmatpush.msra.mxu0 %v23_v5 }
   0x9   :  { %10 = vsyncpa [#allocation3], 0  ;;  %126 = vmatmul.msk.f32.vlgmr.msra.gmra.mxu0 %vm31_vm0, %v21_v7  ;;  %v74_v9 = vld [vmem:[%s290_s3 + $0x58] sm:$0xff]  ;;  %130 = vmatpush.msra.mxu2 %v76_v6  ;;  %v73_v10 = vld [vmem:[%s290_s3 + $0x50] sm:$0xff]  ;;  %s114_s15 = sshll.u32 %s292_s5, 4  ;;  %s176_s16 = smov 128   ;;  %s115_s15 = int_to_ptr.hbm [resolvable:$true] %s114_s15 }
   0xa   :  { %86 = vmatpush.msra.mxu1 %v75_v8  ;;  %v72_v11 = vld [vmem:[%s290_s3 + $0x48] sm:$0xff]  ;;  %v71_v13 = vld [vmem:[%s290_s3 + $0x40] sm:$0xff]  ;;  %v70_v14 = vld [vmem:[%s290_s3 + $0x38] sm:$0xff]  ;;  %s177_s17 = smov 8  }
   0xb   :  { %131 = vmatpush.msra.mxu2 %v75_v8  ;;  %v22_v12 = vld [vmem:[%s287_s0 + $0x8] sm:$0xff]  ;;  %v69_v15 = vld [vmem:[%s290_s3 + $0x30] sm:$0xff]  ;;  %v67_v17 = vld [vmem:[%s290_s3 + $0x20] sm:$0xff] }
   0xc   :  { %87 = vmatpush.msra.mxu1 %v74_v9  ;;  %v68_v16 = vld [vmem:[%s290_s3 + $0x28] sm:$0xff]  ;;  %v66_v18 = vld [vmem:[%s290_s3 + $0x18] sm:$0xff]  ;;  %v65_v19 = vld [vmem:[%s290_s3 + $0x10] sm:$0xff] }
   0xd   :  { %132 = vmatpush.msra.mxu2 %v74_v9  ;;  %v64_v20 = vld [vmem:[%s290_s3 + $0x8] sm:$0xff]  ;;  %v63_v21 = vld [vmem:[%s290_s3] sm:$0xff]  ;;  %s175_s3 = smov [#allocation2]  }
   0xe   :  { %88 = vmatpush.msra.mxu1 %v73_v10  ;;  %v147_v22 = vld [vmem:[%s289_s2] ss:$0 sm:$0xff]  ;;  %s112_s13 = sshll.u32 %s175_s3, 4  ;;  %s113_s13 = int_to_ptr.vmem [resolvable:$true] %s112_s13 }
   0xf   :  { %133 = vmatpush.msra.mxu2 %v73_v10  ;;  %v148_v29 = vld [vmem:[%s291_s4] ss:$0 sm:$0xff] }
  0x10   :  { %89 = vmatpush.msra.mxu1 %v72_v11 }
  0x11   :  { %127 = vmatmul.msk.f32.gmra.mxu0 %vm31_vm0, %v22_v12  ;;  %134 = vmatpush.msra.mxu2 %v72_v11 }
  0x12   :  { %90 = vmatpush.msra.mxu1 %v71_v13 }
  0x13   :  { %135 = vmatpush.msra.mxu2 %v71_v13 }
  0x14   :  { %91 = vmatpush.msra.mxu1 %v70_v14 }
  0x15   :  { %136 = vmatpush.msra.mxu2 %v70_v14 }
  0x16   :  { %92 = vmatpush.msra.mxu1 %v69_v15 }
  0x17   :  { %137 = vmatpush.msra.mxu2 %v69_v15 }
  0x18   :  { %93 = vmatpush.msra.mxu1 %v68_v16 }
  0x19   :  { %138 = vmatpush.msra.mxu2 %v68_v16 }
  0x1a   :  { %94 = vmatpush.msra.mxu1 %v67_v17 }
  0x1b   :  { %139 = vmatpush.msra.mxu2 %v67_v17 }
  0x1c   :  { %95 = vmatpush.msra.mxu1 %v66_v18 }
  0x1d   :  { %140 = vmatpush.msra.mxu2 %v66_v18 }
  0x1e   :  { %96 = vmatpush.msra.mxu1 %v65_v19 }
  0x1f   :  { %141 = vmatpush.msra.mxu2 %v65_v19 }
  0x20   :  { %97 = vmatpush.msra.mxu1 %v64_v20 }
  0x21   :  { %142 = vmatpush.msra.mxu2 %v64_v20 }
  0x22   :  { %98 = vmatpush.msra.mxu1 %v63_v21 }
  0x23   :  { %143 = vmatpush.msra.mxu2 %v63_v21 }
  0x86   :  { %v55_v23 = vpop.f32.mrf.mxu0 }
  0x87   :  { %v56_v24 = vadd.f32 %v147_v22, %v55_v23 }
  0x89   :  { %v61_v25 = vmax.f32 %v56_v24, 0.0 }
  0x8b   :  { %99 = vmatmul.f32.vlgmr.msra.gmra.mxu1 %v61_v25 }
  0x8e   :  { %v58_v26 = vpop.f32.mrf.mxu0 }
  0x8f   :  { %v59_v27 = vadd.f32 %v147_v22, %v58_v26 }
  0x91   :  { %v62_v28 = vmax.f32 %v59_v27, 0.0 }
  0x93   :  { %102 = vmatmul.f32.vlgmr.msra.gmra.mxu2 %v62_v28 }
 0x108   :  { %v100_v30 = vpop.f32.mrf.mxu1 }
 0x109   :  { %v101_v31 = vadd.f32 %v148_v29, %v100_v30 }
 0x10b   :  { %106 = vst.msk [vmem:[#allocation2] sm:$0xff] %vm31_vm0, %v101_v31 }
 0x116   :  { %v103_v32 = vpop.f32.mrf.mxu2 }
 0x117   :  { %v104_v33 = vadd.f32 %v148_v29, %v103_v32 }
 0x119   :  { %107 = vst.msk [vmem:[#allocation2 + $0x8] sm:$0xff] %vm31_vm0, %v104_v33 }
 0x11a   :  { %120 = dma.vmem_to_hbm [thread:$0]  %s113_s13, 256, %s115_s15, [#allocation3], %s176_s16, %s176_s16, %s177_s17  }
 0x11b   :  { %173 = dma.done.wait [#allocation3], 256  }
 0x11c   :  { %174 = vsyncadd [#allocation3], 4294967040 }
 0x11d   :  { %125 = vsyncpa [#allocation3], 1 }

// kernel: tpu_custom_call.1
= control target key start
LH: loop header
LB: loop body
LE: loop exit
PB: predicated region body
PF: predicated region fallthrough
CT: control target
= control target key end

     0   :  { %vm31_vm0 = vcmask 261120   ;;  %s287_s0 = inlined_call_operand.vmem [shape: f32[16,32], index: 0, kind: input, shape index: {}]   ;;  %s288_s1 = inlined_call_operand.vmem [shape: f32[32,128], index: 1, kind: input, shape index: {}]   ;;  %s289_s2 = inlined_call_operand.vmem [shape: f32[1,128], index: 2, kind: input, shape index: {}]   ;;  %s290_s3 = inlined_call_operand.vmem [shape: f32[128,32], index: 3, kind: input, shape index: {}]   ;;  %s291_s4 = inlined_call_operand.vmem [shape: f32[1,32], index: 4, kind: input, shape index: {}]   ;;  %s292_s5 = inlined_call_operand.hbm [shape: f32[16,32], index: 5, kind: output, shape index: {}]  }
   0x1   :  { %v26_v0 = vld [vmem:[%s288_s1 + $0x18] sm:$0xff]  ;;  %v25_v1 = vld [vmem:[%s288_s1 + $0x10] sm:$0xff]  ;;  %v24_v2 = vld [vmem:[%s288_s1 + $0x8] sm:$0xff] }
   0x2   :  { %50 = vmatpush.msra.mxu0 %v26_v0  ;;  %v78_v3 = vld [vmem:[%s290_s3 + $0x78] sm:$0xff]  ;;  %v77_v4 = vld [vmem:[%s290_s3 + $0x70] sm:$0xff]  ;;  %v23_v5 = vld [vmem:[%s288_s1] sm:$0xff] }
   0x3   :  { %83 = vmatpush.msra.mxu1 %v78_v3  ;;  %v76_v6 = vld [vmem:[%s290_s3 + $0x68] sm:$0xff]  ;;  %128 = vmatpush.msra.mxu2 %v78_v3  ;;  %v21_v7 = vld [vmem:[%s287_s0] sm:$0xff] }
   0x4   :  { %51 = vmatpush.msra.mxu0 %v25_v1  ;;  %v75_v8 = vld [vmem:[%s290_s3 + $0x60] sm:$0xff] }
   0x5   :  { %84 = vmatpush.msra.mxu1 %v77_v4  ;;  %129 = vmatpush.msra.mxu2 %v77_v4 }
   0x6   :  { %52 = vmatpush.msra.mxu0 %v24_v2 }
   0x7   :  { %85 = vmatpush.msra.mxu1 %v76_v6 }
   0x8   :  { %53 = vmatpush.msra.mxu0 %v23_v5 }
   0x9   :  { %10 = vsyncpa [#allocation3], 0  ;;  %126 = vmatmul.msk.f32.vlgmr.msra.gmra.mxu0 %vm31_vm0, %v21_v7  ;;  %v74_v9 = vld [vmem:[%s290_s3 + $0x58] sm:$0xff]  ;;  %130 = vmatpush.msra.mxu2 %v76_v6  ;;  %v73_v10 = vld [vmem:[%s290_s3 + $0x50] sm:$0xff]  ;;  %s114_s15 = sshll.u32 %s292_s5, 4  ;;  %s176_s16 = smov 128   ;;  %s115_s15 = int_to_ptr.hbm [resolvable:$true] %s114_s15 }
   0xa   :  { %86 = vmatpush.msra.mxu1 %v75_v8  ;;  %v72_v11 = vld [vmem:[%s290_s3 + $0x48] sm:$0xff]  ;;  %v71_v13 = vld [vmem:[%s290_s3 + $0x40] sm:$0xff]  ;;  %v70_v14 = vld [vmem:[%s290_s3 + $0x38] sm:$0xff]  ;;  %s177_s17 = smov 8  }
   0xb   :  { %131 = vmatpush.msra.mxu2 %v75_v8  ;;  %v22_v12 = vld [vmem:[%s287_s0 + $0x8] sm:$0xff]  ;;  %v69_v15 = vld [vmem:[%s290_s3 + $0x30] sm:$0xff]  ;;  %v67_v17 = vld [vmem:[%s290_s3 + $0x20] sm:$0xff] }
   0xc   :  { %87 = vmatpush.msra.mxu1 %v74_v9  ;;  %v68_v16 = vld [vmem:[%s290_s3 + $0x28] sm:$0xff]  ;;  %v66_v18 = vld [vmem:[%s290_s3 + $0x18] sm:$0xff]  ;;  %v65_v19 = vld [vmem:[%s290_s3 + $0x10] sm:$0xff] }
   0xd   :  { %132 = vmatpush.msra.mxu2 %v74_v9  ;;  %v64_v20 = vld [vmem:[%s290_s3 + $0x8] sm:$0xff]  ;;  %v63_v21 = vld [vmem:[%s290_s3] sm:$0xff]  ;;  %s175_s3 = smov [#allocation2]  }
   0xe   :  { %88 = vmatpush.msra.mxu1 %v73_v10  ;;  %v147_v22 = vld [vmem:[%s289_s2] ss:$0 sm:$0xff]  ;;  %s112_s13 = sshll.u32 %s175_s3, 4  ;;  %s113_s13 = int_to_ptr.vmem [resolvable:$true] %s112_s13 }
   0xf   :  { %133 = vmatpush.msra.mxu2 %v73_v10  ;;  %v148_v29 = vld [vmem:[%s291_s4] ss:$0 sm:$0xff] }
  0x10   :  { %89 = vmatpush.msra.mxu1 %v72_v11 }
  0x11   :  { %127 = vmatmul.msk.f32.gmra.mxu0 %vm31_vm0, %v22_v12  ;;  %134 = vmatpush.msra.mxu2 %v72_v11 }
  0x12   :  { %90 = vmatpush.msra.mxu1 %v71_v13 }
  0x13   :  { %135 = vmatpush.msra.mxu2 %v71_v13 }
  0x14   :  { %91 = vmatpush.msra.mxu1 %v70_v14 }
  0x15   :  { %136 = vmatpush.msra.mxu2 %v70_v14 }
  0x16   :  { %92 = vmatpush.msra.mxu1 %v69_v15 }
  0x17   :  { %137 = vmatpush.msra.mxu2 %v69_v15 }
  0x18   :  { %93 = vmatpush.msra.mxu1 %v68_v16 }
  0x19   :  { %138 = vmatpush.msra.mxu2 %v68_v16 }
  0x1a   :  { %94 = vmatpush.msra.mxu1 %v67_v17 }
  0x1b   :  { %139 = vmatpush.msra.mxu2 %v67_v17 }
  0x1c   :  { %95 = vmatpush.msra.mxu1 %v66_v18 }
  0x1d   :  { %140 = vmatpush.msra.mxu2 %v66_v18 }
  0x1e   :  { %96 = vmatpush.msra.mxu1 %v65_v19 }
  0x1f   :  { %141 = vmatpush.msra.mxu2 %v65_v19 }
  0x20   :  { %97 = vmatpush.msra.mxu1 %v64_v20 }
  0x21   :  { %142 = vmatpush.msra.mxu2 %v64_v20 }
  0x22   :  { %98 = vmatpush.msra.mxu1 %v63_v21 }
  0x23   :  { %143 = vmatpush.msra.mxu2 %v63_v21 }
  0x86   :  { %v55_v23 = vpop.f32.mrf.mxu0 }
  0x87   :  { %v56_v24 = vadd.f32 %v147_v22, %v55_v23 }
  0x89   :  { %v61_v25 = vmax.f32 %v56_v24, 0.0 }
  0x8b   :  { %99 = vmatmul.f32.vlgmr.msra.gmra.mxu1 %v61_v25 }
  0x8e   :  { %v58_v26 = vpop.f32.mrf.mxu0 }
  0x8f   :  { %v59_v27 = vadd.f32 %v147_v22, %v58_v26 }
  0x91   :  { %v62_v28 = vmax.f32 %v59_v27, 0.0 }
  0x93   :  { %102 = vmatmul.f32.vlgmr.msra.gmra.mxu2 %v62_v28 }
 0x108   :  { %v100_v30 = vpop.f32.mrf.mxu1 }
 0x109   :  { %v101_v31 = vadd.f32 %v148_v29, %v100_v30 }
 0x10b   :  { %106 = vst.msk [vmem:[#allocation2] sm:$0xff] %vm31_vm0, %v101_v31 }
 0x116   :  { %v103_v32 = vpop.f32.mrf.mxu2 }
 0x117   :  { %v104_v33 = vadd.f32 %v148_v29, %v103_v32 }
 0x119   :  { %107 = vst.msk [vmem:[#allocation2 + $0x8] sm:$0xff] %vm31_vm0, %v104_v33 }
 0x11a   :  { %120 = dma.vmem_to_hbm [thread:$0]  %s113_s13, 256, %s115_s15, [#allocation3], %s176_s16, %s176_s16, %s177_s17  }
 0x11b   :  { %173 = dma.done.wait [#allocation3], 256  }
 0x11c   :  { %174 = vsyncadd [#allocation3], 4294967040 }
 0x11d   :  { %125 = vsyncpa [#allocation3], 1 }

</bundles_post_ra>
